<compile_context>
chip_gen: v7x
topology: tpu7x:2x2x1
jax: 0.10.0
libtpu: 0.0.40
codegen_flags: <defaults>
</compile_context>

<pallas_src>
import functools
import math

import jax
import jax.numpy as jnp
from jax.experimental import pallas as pl
from jax.experimental.pallas import tpu as pltpu

_MIB = 1024 * 1024


# --------------------------------------------------------------------------
# Kernel body
# --------------------------------------------------------------------------
def _rmsnorm_kernel(x_ref, w_ref, o_ref, *, eps, fuse_weight_f32):
    x = x_ref[...]                                   # (TR, D), input dtype
    xf = x.astype(jnp.float32)                       # x.float()
    dim = x.shape[-1]
    # sum * (1/dim) instead of mean: VPU partial sums + one XLU reduce,
    # rsqrt goes to the EUP — all in slots the DMA-bound kernel has free.
    ms = jnp.sum(xf * xf, axis=-1, keepdims=True) * (1.0 / dim)
    inv = jax.lax.rsqrt(ms + eps)                    # rsqrt(mean(x^2) + eps)
    if fuse_weight_f32:
        # Opt-in single-rounding path (weight arrives pre-cast to f32): scale
        # in f32, downcast once.  Cheaper on v5e (no bf16 VPU), slightly more
        # precise than PyTorch's .type_as(x) double rounding.
        o_ref[...] = (xf * inv * w_ref[...]).astype(o_ref.dtype)
    else:
        # PyTorch parity: _norm(x.float()).type_as(x) * weight
        normed = (xf * inv).astype(x.dtype)          # .type_as(x)
        o_ref[...] = normed.astype(o_ref.dtype) * w_ref[...]


# --------------------------------------------------------------------------
# Generation-aware tile sizing
# --------------------------------------------------------------------------
def _tpu_info():
    try:
        return pltpu.get_tpu_info()
    except Exception:
        return None


def _vmem_physical_bytes(info):
    if info is not None:
        try:
            return int(info.vmem_capacity_bytes)
        except Exception:
            pass
    return 64 * _MIB  # conservative fallback: v7x per-TensorCore VMEM


def _num_tensorcores(info):
    """TensorCores per chip; 1 on v5e/v6e, 2 on v7x."""
    if info is None:
        return 1
    for attr in ("num_tensorcores", "tensorcore_count", "tensorcores_per_chip"):
        v = getattr(info, attr, None)
        try:
            v = int(v)
        except (TypeError, ValueError):
            continue
        if v > 0:
            return v
    name = str(getattr(info, "chip_version", "")).lower()
    return 2 if "7" in name else 1


def _pick_row_tile(rows, dim, in_dtype, out_dtype):
    """Largest row tile whose pipeline buffers + f32 temps fit the VMEM budget,
    capped in *bytes* of HBM traffic per step (not rows)."""
    info = _tpu_info()
    vmem_physical = _vmem_physical_bytes(info)
    num_tc = _num_tensorcores(info)

    in_bytes = jnp.dtype(in_dtype).itemsize
    out_bytes = jnp.dtype(out_dtype).itemsize

    # Sublane packing factor of the narrowest dtype: 8 f32, 16 bf16, 32 int8.
    pack = 8 * max(1, 4 // max(1, min(in_bytes, out_bytes)))

    # ---- VMEM bytes per tiled row -----------------------------------------
    # 2x double-buffered input + 2x double-buffered output + ~2 un-double-
    # buffered f32 intermediates (xf and xf*inv) that Mosaic materializes
    # because of the reduce-then-scale dependence.
    per_row_vmem = 2 * dim * in_bytes + 2 * dim * out_bytes + 2 * dim * 4

    # Leave ~1/4 of physical VMEM for compiler scratch / neighboring fusions;
    # give ~2/3 of the remainder to this kernel's buffers.  Unlike a fixed
    # "physical/3" rule this does NOT shrink per-step bytes on v7x (64 MiB
    # VMEM, 3.2 TB/s HBM) exactly when larger steps are needed.
    usable = (vmem_physical * 3) // 4
    tile_budget = (usable * 2) // 3
    tr = max(pack, tile_budget // per_row_vmem)

    # ---- Byte-based cap (replaces a fixed row cap) -------------------------
    # Once a step moves ~32 MiB of combined in+out HBM traffic, the ~0.35us
    # fixed step overhead is <1% — bigger tiles buy nothing.
    per_row_hbm = dim * (in_bytes + out_bytes)
    tr = min(tr, max(pack, (32 * _MIB) // per_row_hbm))
    tr = max(pack, (tr // pack) * pack)

    rows_padded = ((rows + pack - 1) // pack) * pack
    tr = min(tr, rows_padded)

    # ---- Multi-TensorCore shaping (v7x only; no-op on single-TC v5e/v6e) ---
    if num_tc > 1 and rows_padded > pack:
        steps = -(-rows // tr)
        if steps % num_tc != 0 and steps <= 8:
            tgt_steps = ((steps + num_tc - 1) // num_tc) * num_tc
            cand = ((-(-rows_padded // tgt_steps)) + pack - 1) // pack * pack
            cand = max(pack, min(cand, rows_padded))
            if (-(-rows // cand)) % num_tc == 0:
                tr = cand

    # ---- VMEM limit: footprint + headroom, not a fraction of physical ------
    footprint = (2 * tr * dim * in_bytes      # double-buffered input tiles
                 + 2 * tr * dim * out_bytes   # double-buffered output tiles
                 + 2 * tr * dim * 4           # f32 intermediates
                 + 2 * dim * max(out_bytes, 4))  # resident weight row
    vmem_limit = int(min(vmem_physical * 3 // 4, footprint + 8 * _MIB))
    vmem_limit = max(vmem_limit, 16 * _MIB)
    return tr, vmem_limit


# --------------------------------------------------------------------------
# Public wrapper
# --------------------------------------------------------------------------
def rmsnorm(x, weight, eps=1e-6, *, row_tile=None, out_dtype=None,
            fuse_weight_f32=False):
    """RMSNorm over the last axis of x, scaled by `weight` (shape [dim]).

    out_dtype: result dtype.  Default matches PyTorch (promote(x, weight)).
      For bf16 activations + f32 weight, pass out_dtype=x.dtype to cut HBM
      writeback from 6 B/elem to 4 B/elem (~1.5x faster; kernel is
      writeback-bound).
    fuse_weight_f32: opt-in single-rounding path (scale by weight in f32, one
      downcast).  Cheaper on v5e; slightly deviates from PyTorch's .type_as(x)
      double rounding, so off by default.
    """
    orig_shape = x.shape
    dim = orig_shape[-1]
    rows = math.prod(orig_shape[:-1]) if len(orig_shape) > 1 else 1

    if out_dtype is None:
        out_dtype = jnp.promote_types(x.dtype, weight.dtype)
    in_bytes = jnp.dtype(x.dtype).itemsize
    out_bytes = jnp.dtype(out_dtype).itemsize

    x2 = x.reshape(rows, dim)
    w_dtype = jnp.float32 if fuse_weight_f32 else out_dtype
    w2 = weight.astype(w_dtype).reshape(1, dim)   # pre-cast once, resident block

    tr_auto, vmem_limit = _pick_row_tile(rows, dim, x.dtype, out_dtype)
    tr = row_tile if row_tile is not None else tr_auto

    grid = (pl.cdiv(rows, tr),)  # partial last block is fine: rows independent

    out2 = pl.pallas_call(
        functools.partial(_rmsnorm_kernel, eps=eps,
                          fuse_weight_f32=fuse_weight_f32),
        out_shape=jax.ShapeDtypeStruct((rows, dim), out_dtype),
        grid_spec=pltpu.PrefetchScalarGridSpec(
            num_scalar_prefetch=0,
            grid=grid,
            in_specs=[
                pl.BlockSpec((tr, dim), lambda i: (i, 0)),
                pl.BlockSpec((1, dim), lambda i: (0, 0)),
            ],
            out_specs=pl.BlockSpec((tr, dim), lambda i: (i, 0)),
        ),
        compiler_params=pltpu.CompilerParams(
            dimension_semantics=("parallel",),
            vmem_limit_bytes=vmem_limit,
        ),
        cost_estimate=pl.CostEstimate(
            flops=4 * rows * dim,
            transcendentals=rows,
            bytes_accessed=rows * dim * (in_bytes + out_bytes) + dim * out_bytes,
        ),
    )(x2, w2)

    return out2.reshape(orig_shape)


# --------------------------------------------------------------------------
# Smoke test
# --------------------------------------------------------------------------
if __name__ == "__main__":
    key = jax.random.PRNGKey(0)
    batch, seq, hidden = 2, 8, 32
    eps = 1e-6

    x = jax.random.normal(key, (batch, seq, hidden), dtype=jnp.float32)
    # Deterministic param init: RMSNorm weight initialized to ones (as in __init__).
    weight = jnp.ones((hidden,), dtype=jnp.float32)

    def ref_fn(xx, ww):
        xf = xx.astype(jnp.float32)
        inv = jax.lax.rsqrt(jnp.mean(xf * xf, axis=-1, keepdims=True) + eps)
        return (xf * inv).astype(xx.dtype) * ww

    # Default path: exact PyTorch semantics (promote dtype, .type_as rounding).
    out = jax.block_until_ready(rmsnorm(x, weight, eps=eps))
    ref = ref_fn(x, weight)
    assert out.shape == x.shape
    assert out.dtype == ref.dtype
    assert jnp.allclose(out, ref, atol=1e-5, rtol=1e-5)

    # Partial-block path: fewer rows than one sublane pack (masked stores).
    x1 = jax.random.normal(jax.random.PRNGKey(1), (1, hidden), dtype=jnp.float32)
    out1 = jax.block_until_ready(rmsnorm(x1, weight, eps=eps))
    assert jnp.allclose(out1, ref_fn(x1, weight), atol=1e-5, rtol=1e-5)

    # Reduced-writeback path: bf16 activations, bf16 output (4 B/elem HBM).
    xb = x.astype(jnp.bfloat16)
    outb = jax.block_until_ready(rmsnorm(xb, weight, eps=eps, out_dtype=xb.dtype))
    assert outb.dtype == jnp.bfloat16
    assert jnp.allclose(outb.astype(jnp.float32),
                        ref_fn(xb, weight).astype(jnp.float32),
                        atol=2e-2, rtol=2e-2)

    print("KERNEL_OK")
</pallas_src>

<mosaic_0001>
module attributes {stable_mosaic.version = 11 : i64} {
  func.func @_rmsnorm_kernel(%arg0: i32, %arg1: memref<16x32xf32, #tpu.memory_space<vmem>>, %arg2: memref<1x32xf32, #tpu.memory_space<vmem>>, %arg3: memref<16x32xf32, #tpu.memory_space<vmem>>) attributes {dimension_semantics = [#tpu.dimension_semantics<parallel>], iteration_bounds = array<i64: 1>, scalar_prefetch = 0 : i64, scratch_operands = 0 : i64, tpu.core_type = #tpu.core_type<tc>, window_params = [{transform_indices = @transform_0, window_bounds = array<i64: 16, 32>}, {pipeline_mode = #tpu.pipeline_mode<synchronous>, transform_indices = @transform_1, window_bounds = array<i64: 1, 32>}, {transform_indices = @transform_2, window_bounds = array<i64: 16, 32>}]} {
    %c0 = arith.constant 0 : index
    %c0_0 = arith.constant 0 : index
    %0 = vector.load %arg1[%c0, %c0_0] : memref<16x32xf32, #tpu.memory_space<vmem>>, vector<16x32xf32>
    %1 = arith.mulf %0, %0 : vector<16x32xf32>
    %cst = arith.constant dense<0.000000e+00> : vector<16xf32>
    %2 = vector.multi_reduction <add>, %1, %cst [1] : vector<16x32xf32> to vector<16xf32>
    %3 = vector.shape_cast %2 : vector<16xf32> to vector<16x1xf32>
    %cst_1 = arith.constant 3.125000e-02 : f32
    %4 = vector.broadcast %cst_1 : f32 to vector<16x1xf32>
    %5 = arith.mulf %3, %4 : vector<16x1xf32>
    %cst_2 = arith.constant 9.99999997E-7 : f32
    %6 = vector.broadcast %cst_2 : f32 to vector<16x1xf32>
    %7 = arith.addf %5, %6 : vector<16x1xf32>
    %8 = math.rsqrt %7 : vector<16x1xf32>
    %9 = vector.broadcast %8 : vector<16x1xf32> to vector<16x32xf32>
    %10 = arith.mulf %0, %9 : vector<16x32xf32>
    %c0_3 = arith.constant 0 : index
    %c0_4 = arith.constant 0 : index
    %11 = vector.load %arg2[%c0_3, %c0_4] : memref<1x32xf32, #tpu.memory_space<vmem>>, vector<1x32xf32>
    %12 = vector.broadcast %11 : vector<1x32xf32> to vector<16x32xf32>
    %13 = arith.mulf %10, %12 : vector<16x32xf32>
    %c0_5 = arith.constant 0 : index
    %c0_6 = arith.constant 0 : index
    %14 = vector.load %arg3[%c0_5, %c0_6] : memref<16x32xf32, #tpu.memory_space<vmem>>, vector<16x32xf32>
    tpu.vector_store %arg3[%c0_5, %c0_6], %13 {strides = array<i32>} : memref<16x32xf32, #tpu.memory_space<vmem>>, vector<16x32xf32>,
    return
  }
  func.func @transform_0(%arg0: i32) -> (i32, i32) {
    %c0_i32 = arith.constant 0 : i32
    %c0_i32_0 = arith.constant 0 : i32
    return %arg0, %c0_i32 : i32, i32
  }
  func.func @transform_1(%arg0: i32) -> (i32, i32) {
    %c0_i32 = arith.constant 0 : i32
    %c0_i32_0 = arith.constant 0 : i32
    %c0_i32_1 = arith.constant 0 : i32
    return %c0_i32, %c0_i32_0 : i32, i32
  }
  func.func @transform_2(%arg0: i32) -> (i32, i32) {
    %c0_i32 = arith.constant 0 : i32
    %c0_i32_0 = arith.constant 0 : i32
    return %arg0, %c0_i32 : i32, i32
  }
}

</mosaic_0001>

<bundles_post_ra>
// kernel: tpu_custom_call.1
= control target key start
LH: loop header
LB: loop body
LE: loop exit
PB: predicated region body
PF: predicated region fallthrough
CT: control target
= control target key end

     0   :  { %7 = vsyncpa [#allocation3], 0  ;;  %s186_s0 = inlined_call_operand.hbm [shape: f32[16,32], index: 0, kind: input, shape index: {}]   ;;  %s187_s1 = inlined_call_operand.vmem [shape: f32[1,32], index: 1, kind: input, shape index: {}]   ;;  %s188_s2 = inlined_call_operand.hbm [shape: f32[16,32], index: 2, kind: output, shape index: {}]  }
   0x1   :  { %8 = vsyncpa [#allocation4], 0  ;;  %s130_s9 = smov [#allocation2]   ;;  %s82_s13 = scalar_lea.hbm %s186_s0, 256 }
   0x2   :  { %s14_s10 = sshll.u32 %s130_s9, 4  ;;  %p83_p0 = scmp.ne.s32.totalorder %s186_s0, %s82_s13  ;;  %s15_s10 = int_to_ptr.vmem [resolvable:$true] %s14_s10 }
   0x3   :  { %p86_p1 = scmp.lt.u32.totalorder %s82_s13, %s186_s0 }
   0x5   :  { %p88_p2 = pnand %p86_p1, %p83_p0 }
   0x7   :  { %91 = shalt.err (!%p88_p2)
}
   0x8   :  { %s92_s18 = scalar_lea.vmem %s15_s10, 256  ;;  %p97_p4 = scmp.lt.s32.totalorder %s15_s10, %s15_s10 }
   0x9   :  { %p93_p3 = scmp.ne.s32.totalorder %s15_s10, %s92_s18  ;;  %p98_p5 = scmp.lt.s32.totalorder %s92_s18, %s92_s18 }
   0xb   :  { %p99_p6 = por %p98_p5, %p97_p4 }
   0xd   :  { %p100_p7 = pnand %p99_p6, %p93_p3 }
   0xf   :  { %103 = shalt.err (!%p100_p7)
}
  0x10   :  { %s131_s19 = smov 128   ;;  %s132_s20 = smov 8  }
  0x11   :  { %20 = dma.hbm_to_vmem [thread:$0]  %s186_s0, 256, %s15_s10, [#allocation3], %s131_s19, %s131_s19, %s132_s20  }
  0x12   :  { %126 = dma.done.wait [#allocation3], 256  }
  0x13   :  { %127 = vsyncadd [#allocation3], 4294967040  ;;  %v26_v0 = vld [vmem:[#allocation2] sm:$0xff]  ;;  %vm30_vm0 = vcmask 261120   ;;  %v27_v1 = vld [vmem:[#allocation2 + $0x8] sm:$0xff]  ;;  %s133_s24 = smov [#allocation5]  }
  0x14   :  { %v28_v2 = vmul.f32 %v26_v0, %v26_v0  ;;  %v29_v3 = vmul.f32 %v27_v1, %v27_v1  ;;  %v73_v13 = vld [vmem:[%s187_s1] ss:$0 sm:$0xff]  ;;  %s61_s25 = sshll.u32 %s133_s24, 4  ;;  %s62_s25 = int_to_ptr.vmem [resolvable:$true] %s61_s25 }
  0x15   :  { %s104_s26 = scalar_lea.vmem %s62_s25, 256  ;;  %p109_p9 = scmp.lt.s32.totalorder %s62_s25, %s62_s25 }
  0x16   :  { %v31_v4 = vsel %vm30_vm0, %v28_v2, 0.0  ;;  %v34_v5 = vsel %vm30_vm0, %v29_v3, 0.0  ;;  %p105_p8 = scmp.ne.s32.totalorder %s62_s25, %s104_s26  ;;  %p110_p10 = scmp.lt.s32.totalorder %s104_s26, %s104_s26 }
  0x17   :  { %32 = vadd.xlane.f32.xlu0 %v31_v4 }
  0x18   :  { %p111_p11 = por %p110_p10, %p109_p9 }
  0x1a   :  { %p112_p12 = pnand %p111_p11, %p105_p8 }
  0x1b   :  { %35 = vadd.xlane.f32.xlu0 %v34_v5 }
  0xa4   :  { %v33_v6 = vpop.xlane.xlu0 %32 }
  0xa5   :  { %v37_v7 = vmul.f32 0.03125, %v33_v6 }
  0xa7   :  { %v39_v8 = vadd.f32 1e-06, %v37_v7 }
  0xa8   :  { %v36_v9 = vpop.xlane.xlu0 %35 }
  0xa9   :  { %78 = vrsqrt.f32 %v39_v8  ;;  %v38_v10 = vmul.f32 0.03125, %v36_v9 }
  0xab   :  { %v40_v11 = vadd.f32 1e-06, %v38_v10 }
  0xad   :  { %80 = vrsqrt.f32 %v40_v11 }
  0xb3   :  { %v79_v12 = vpop.eup %78 }
  0xb4   :  { %v43_v14 = vmul.f32 %v79_v12, %v26_v0 }
  0xb6   :  { %v52_v15 = vmul.f32 %v73_v13, %v43_v14 }
  0xb7   :  { %v81_v16 = vpop.eup %80 }
  0xb8   :  { %v44_v17 = vmul.f32 %v81_v16, %v27_v1  ;;  %54 = vst.msk [vmem:[#allocation5] sm:$0xff] %vm30_vm0, %v52_v15 }
  0xba   :  { %v53_v18 = vmul.f32 %v73_v13, %v44_v17 }
  0xbc   :  { %55 = vst.msk [vmem:[#allocation5 + $0x8] sm:$0xff] %vm30_vm0, %v53_v18 }
  0xbd   :  { %115 = shalt.err (!%p112_p12)
}
  0xbe   :  { %s116_s28 = scalar_lea.hbm %s188_s2, 256 }
  0xbf   :  { %p117_p13 = scmp.ne.s32.totalorder %s188_s2, %s116_s28  ;;  %p120_p0 = scmp.lt.u32.totalorder %s116_s28, %s188_s2 }
  0xc1   :  { %p122_p1 = pnand %p120_p0, %p117_p13 }
  0xc3   :  { %125 = shalt.err (!%p122_p1)
}
  0xc4   :  { %67 = dma.vmem_to_hbm [thread:$0]  %s62_s25, 256, %s188_s2, [#allocation4], %s131_s19, %s131_s19, %s132_s20  }
  0xc5   :  { %128 = dma.done.wait [#allocation4], 256  }
  0xc6   :  { %129 = vsyncadd [#allocation4], 4294967040 }
  0xc7   :  { %71 = vsyncpa [#allocation3], 1 }
  0xc8   :  { %72 = vsyncpa [#allocation4], 1 }

</bundles_post_ra>
